<compile_context>
chip_gen: v6e
topology: v6e:2x2x1
jax: 0.10.0
libtpu: 0.0.40
codegen_flags: <defaults>
</compile_context>

<pallas_src>
import math
import numpy as np
import jax
import jax.numpy as jnp
from jax.experimental import pallas as pl
from jax.experimental.pallas import tpu as pltpu


# ----------------------------------------------------------------------------
# Mask / block-degree construction (mirrors _create_block_degree, mode='seq',
# which is what BlockMaskedLinear uses when rand_mask=False and is_output=False)
# ----------------------------------------------------------------------------
def create_block_degree_seq(feature, num_block):
    tmp = []
    for f in feature:
        block_feature_i = math.ceil(f / (num_block - 1))
        base = np.arange(1, num_block, dtype=np.int64)          # [1 .. num_block-1]
        block_degree_i = np.tile(base, block_feature_i)[:f]
        tmp.append(block_degree_i)
    return np.concatenate(tmp)[: sum(feature)]


def mask_from_degrees(out_degree, in_degree):
    # mask[o, i] = (out_degree[o] >= in_degree[i]),  torch layout [out, in]
    return (out_degree[:, None] >= in_degree[None, :]).astype(np.float32)


# ----------------------------------------------------------------------------
# Pallas kernel: relu -> masked matmul -> relu -> masked matmul -> residual.
# Masks are already folded into the (pre-transposed, padded, bf16) weights.
# ----------------------------------------------------------------------------
def block_masked_residual_kernel(x_ref, w0_ref, b0_ref, w1_ref, b1_ref, o_ref):
    x = x_ref[...]                                        # (bb, Fp) f32
    h = jnp.maximum(x, 0.0)                               # relu(x), f32 on VPU
    # Linear 0: bf16 operands, f32 MXU accumulation, f32 bias add.
    h = jnp.dot(h.astype(w0_ref.dtype), w0_ref[...],
                preferred_element_type=jnp.float32) + b0_ref[...]
    h = jnp.maximum(h, 0.0)                               # relu
    # dropout p=0.0 -> identity (eval-mode / zero-prob dropout)
    # Linear 1
    h = jnp.dot(h.astype(w1_ref.dtype), w1_ref[...],
                preferred_element_type=jnp.float32) + b1_ref[...]
    o_ref[...] = x + h                                    # residual, f32


def _round_up(n, m):
    return ((n + m - 1) // m) * m


def block_masked_residual_layer(x, w0, mask0, b0, w1, mask1, b1, *,
                                block_b=256, weight_dtype=jnp.bfloat16,
                                single_buffer_weights=True):
    """x: (B, F) f32. w*/mask*: torch layout [out, in]. b*: (F,).

    Masks are folded into the weights and the weights transposed to (in, out)
    on the host/XLA side; batch and feature dims are zero-padded to tile /
    lane-aligned sizes (padding provably does not change the valid outputs).
    """
    B, F = x.shape
    Fp = _round_up(F, 128)                      # lane-dense feature dim
    # Batch tile: big enough to fill the MXU, but never bigger than the
    # (sublane-rounded) batch.  On v7x pick block_b so B/bb stays even, keeping
    # both TensorCores busy on the "parallel" grid axis.
    bb = min(block_b, _round_up(B, 8))
    Bp = _round_up(B, bb)

    f32 = jnp.float32
    # Fold masks (static) into weights, transpose to (in, out), pad, cast.
    w0m = (jnp.asarray(w0, f32) * jnp.asarray(mask0, f32)).T
    w1m = (jnp.asarray(w1, f32) * jnp.asarray(mask1, f32)).T
    w0p = jnp.pad(w0m, ((0, Fp - F), (0, Fp - F))).astype(weight_dtype)
    w1p = jnp.pad(w1m, ((0, Fp - F), (0, Fp - F))).astype(weight_dtype)
    b0p = jnp.pad(jnp.asarray(b0, f32), (0, Fp - F)).reshape(1, Fp)
    b1p = jnp.pad(jnp.asarray(b1, f32), (0, Fp - F)).reshape(1, Fp)
    xp = jnp.pad(jnp.asarray(x, f32), ((0, Bp - B), (0, Fp - F)))

    wbytes = w0p.dtype.itemsize
    grid = (Bp // bb,)

    def run(single_buffer):
        wspec_kwargs = dict(pipeline_mode=pl.Buffered(1)) if single_buffer else {}
        wspec = pl.BlockSpec((Fp, Fp), lambda i: (0, 0), **wspec_kwargs)
        bspec = pl.BlockSpec((1, Fp), lambda i: (0, 0))
        xspec = pl.BlockSpec((bb, Fp), lambda i: (i, 0))
        ospec = pl.BlockSpec((bb, Fp), lambda i: (i, 0))

        # VMEM budget estimate -> only raise the scoped limit when needed.
        weight_bufs = 1 if single_buffer else 2
        vmem_need = (2 * weight_bufs * Fp * Fp * wbytes   # two weight matrices
                     + 2 * 2 * bb * Fp * 4                # x + out tiles (dbl-buf)
                     + 2 * 2 * Fp * 4                     # biases
                     + (2 << 20))                         # slack
        vmem_limit = None
        if vmem_need > (30 << 20):
            vmem_limit = min(int(vmem_need * 1.25), 120 << 20)

        cost = pl.CostEstimate(
            flops=2 * 2 * Bp * Fp * Fp,                   # two matmuls
            transcendentals=0,
            bytes_accessed=2 * Fp * Fp * wbytes + 2 * Bp * Fp * 4 + 2 * Fp * 4,
        )

        return pl.pallas_call(
            block_masked_residual_kernel,
            out_shape=jax.ShapeDtypeStruct((Bp, Fp), jnp.float32),
            grid_spec=pltpu.PrefetchScalarGridSpec(
                num_scalar_prefetch=0,
                grid=grid,
                in_specs=[xspec, wspec, bspec, wspec, bspec],
                out_specs=ospec,
            ),
            compiler_params=pltpu.CompilerParams(
                dimension_semantics=("parallel",),
                vmem_limit_bytes=vmem_limit,
            ),
            cost_estimate=cost,
        )(xp, w0p, b0p, w1p, b1p)

    try:
        out = run(single_buffer_weights)
    except Exception:
        # Fallback if this JAX build rejects Buffered(1) on pallas_call specs.
        out = run(False)

    return out[:B, :F]


# ----------------------------------------------------------------------------
# Parameter construction (deterministic, mirrors __init__ shapes/semantics)
# ----------------------------------------------------------------------------
def build_params(key, feature, num_block):
    F_all = sum(feature)

    # in_block_degree would come from a previous masked layer; build it
    # deterministically with the same 'seq' scheme.
    in_block_degree = create_block_degree_seq(feature, num_block)

    # linear_layer_0: seq degrees over out_feature, mask vs in_block_degree
    deg0 = create_block_degree_seq(feature, num_block)
    mask0 = mask_from_degrees(deg0, in_block_degree)        # [out, in]
    # linear_layer_1: seq degrees over out_feature, mask vs deg0
    deg1 = create_block_degree_seq(feature, num_block)
    mask1 = mask_from_degrees(deg1, deg0)                   # [out, in]

    k0, k1, k2, k3 = jax.random.split(key, 4)
    bound = 1.0 / math.sqrt(F_all)
    # layer 0: nn.Linear default-style uniform init (deterministic synthetic)
    w0 = jax.random.uniform(k0, (F_all, F_all), jnp.float32, -bound, bound)  # [out, in]
    b0 = jax.random.uniform(k1, (F_all,), jnp.float32, -bound, bound)
    # layer 1: zero_initialization=True -> uniform(-0.001, 0.001)
    w1 = jax.random.uniform(k2, (F_all, F_all), jnp.float32, -0.001, 0.001)  # [out, in]
    b1 = jax.random.uniform(k3, (F_all,), jnp.float32, -0.001, 0.001)

    return (w0, jnp.asarray(mask0), b0,
            w1, jnp.asarray(mask1), b1)


def reference_forward(x, w0, mask0, b0, w1, mask1, b1):
    # pure-JAX reference mirroring the torch forward exactly (torch [out,in] layout)
    r = jnp.maximum(x, 0.0)
    r = r @ (w0 * mask0).T + b0
    r = jnp.maximum(r, 0.0)
    r = r @ (w1 * mask1).T + b1
    return x + r


def _check(batch, feature, num_block, seed, **kwargs):
    key = jax.random.PRNGKey(seed)
    kx, kp = jax.random.split(key)
    x = jax.random.normal(kx, (batch, sum(feature)), jnp.float32)
    w0, mask0, b0, w1, mask1, b1 = build_params(kp, feature, num_block)

    out = block_masked_residual_layer(x, w0, mask0, b0, w1, mask1, b1, **kwargs)
    out = jax.block_until_ready(out)

    ref = reference_forward(x, w0, mask0, b0, w1, mask1, b1)
    # bf16 matmul operands (f32 accumulation) -> loosened tolerance.
    assert jnp.allclose(out, ref, atol=1e-2, rtol=1e-2), "mismatch vs reference"


if __name__ == "__main__":
    # Small test configs consistent with the module (in_feature == out_feature).
    _check(batch=16, feature=[32], num_block=4, seed=0)
    # Exercise feature/batch padding and a multi-step grid reusing the
    # single-buffered weight blocks across grid iterations.
    _check(batch=40, feature=[48], num_block=5, seed=0, block_b=16)

    print("KERNEL_OK")
</pallas_src>

<mosaic_0001>
module attributes {stable_mosaic.version = 11 : i64} {
  func.func @block_masked_residual_kernel(%arg0: i32, %arg1: memref<16x128xf32, #tpu.memory_space<vmem>>, %arg2: memref<128x128xbf16, #tpu.memory_space<vmem>>, %arg3: memref<1x128xf32, #tpu.memory_space<vmem>>, %arg4: memref<128x128xbf16, #tpu.memory_space<vmem>>, %arg5: memref<1x128xf32, #tpu.memory_space<vmem>>, %arg6: memref<16x128xf32, #tpu.memory_space<vmem>>) attributes {dimension_semantics = [#tpu.dimension_semantics<parallel>], iteration_bounds = array<i64: 1>, scalar_prefetch = 0 : i64, scratch_operands = 0 : i64, tpu.core_type = #tpu.core_type<tc>, window_params = [{transform_indices = @transform_0, window_bounds = array<i64: 16, 128>}, {pipeline_mode = #tpu.pipeline_mode<synchronous>, transform_indices = @transform_1, window_bounds = array<i64: 128, 128>}, {pipeline_mode = #tpu.pipeline_mode<synchronous>, transform_indices = @transform_2, window_bounds = array<i64: 1, 128>}, {pipeline_mode = #tpu.pipeline_mode<synchronous>, transform_indices = @transform_3, window_bounds = array<i64: 128, 128>}, {pipeline_mode = #tpu.pipeline_mode<synchronous>, transform_indices = @transform_4, window_bounds = array<i64: 1, 128>}, {transform_indices = @transform_5, window_bounds = array<i64: 16, 128>}]} {
    %c0 = arith.constant 0 : index
    %c0_0 = arith.constant 0 : index
    %0 = vector.load %arg1[%c0, %c0_0] : memref<16x128xf32, #tpu.memory_space<vmem>>, vector<16x128xf32>
    %cst = arith.constant 0.000000e+00 : f32
    %1 = vector.broadcast %cst : f32 to vector<16x128xf32>
    %2 = arith.maximumf %0, %1 : vector<16x128xf32>
    %3 = arith.truncf %2 : vector<16x128xf32> to vector<16x128xbf16>
    %c0_1 = arith.constant 0 : index
    %c0_2 = arith.constant 0 : index
    %4 = vector.load %arg2[%c0_1, %c0_2] : memref<128x128xbf16, #tpu.memory_space<vmem>>, vector<128x128xbf16>
    %cst_3 = arith.constant dense<0.000000e+00> : vector<16x128xf32>
    %5 = tpu.matmul %3, %4, %cst_3 {dimension_numbers = #tpu.dot_dimension_numbers<[1], [0], [0], [1], [0, 0, 1, 1], [], []>} : vector<16x128xbf16>, vector<128x128xbf16>, vector<16x128xf32> -> vector<16x128xf32>
    %c0_4 = arith.constant 0 : index
    %c0_5 = arith.constant 0 : index
    %6 = vector.load %arg3[%c0_4, %c0_5] : memref<1x128xf32, #tpu.memory_space<vmem>>, vector<1x128xf32>
    %7 = vector.broadcast %6 : vector<1x128xf32> to vector<16x128xf32>
    %8 = arith.addf %5, %7 : vector<16x128xf32>
    %cst_6 = arith.constant 0.000000e+00 : f32
    %9 = vector.broadcast %cst_6 : f32 to vector<16x128xf32>
    %10 = arith.maximumf %8, %9 : vector<16x128xf32>
    %11 = arith.truncf %10 : vector<16x128xf32> to vector<16x128xbf16>
    %c0_7 = arith.constant 0 : index
    %c0_8 = arith.constant 0 : index
    %12 = vector.load %arg4[%c0_7, %c0_8] : memref<128x128xbf16, #tpu.memory_space<vmem>>, vector<128x128xbf16>
    %cst_9 = arith.constant dense<0.000000e+00> : vector<16x128xf32>
    %13 = tpu.matmul %11, %12, %cst_9 {dimension_numbers = #tpu.dot_dimension_numbers<[1], [0], [0], [1], [0, 0, 1, 1], [], []>} : vector<16x128xbf16>, vector<128x128xbf16>, vector<16x128xf32> -> vector<16x128xf32>
    %c0_10 = arith.constant 0 : index
    %c0_11 = arith.constant 0 : index
    %14 = vector.load %arg5[%c0_10, %c0_11] : memref<1x128xf32, #tpu.memory_space<vmem>>, vector<1x128xf32>
    %15 = vector.broadcast %14 : vector<1x128xf32> to vector<16x128xf32>
    %16 = arith.addf %13, %15 : vector<16x128xf32>
    %17 = arith.addf %0, %16 : vector<16x128xf32>
    %c0_12 = arith.constant 0 : index
    %c0_13 = arith.constant 0 : index
    %18 = vector.load %arg6[%c0_12, %c0_13] : memref<16x128xf32, #tpu.memory_space<vmem>>, vector<16x128xf32>
    tpu.vector_store %arg6[%c0_12, %c0_13], %17 {strides = array<i32>} : memref<16x128xf32, #tpu.memory_space<vmem>>, vector<16x128xf32>,
    return
  }
  func.func @transform_0(%arg0: i32) -> (i32, i32) {
    %c0_i32 = arith.constant 0 : i32
    %c0_i32_0 = arith.constant 0 : i32
    return %arg0, %c0_i32 : i32, i32
  }
  func.func @transform_1(%arg0: i32) -> (i32, i32) {
    %c0_i32 = arith.constant 0 : i32
    %c0_i32_0 = arith.constant 0 : i32
    %c0_i32_1 = arith.constant 0 : i32
    return %c0_i32, %c0_i32_0 : i32, i32
  }
  func.func @transform_2(%arg0: i32) -> (i32, i32) {
    %c0_i32 = arith.constant 0 : i32
    %c0_i32_0 = arith.constant 0 : i32
    %c0_i32_1 = arith.constant 0 : i32
    return %c0_i32, %c0_i32_0 : i32, i32
  }
  func.func @transform_3(%arg0: i32) -> (i32, i32) {
    %c0_i32 = arith.constant 0 : i32
    %c0_i32_0 = arith.constant 0 : i32
    %c0_i32_1 = arith.constant 0 : i32
    return %c0_i32, %c0_i32_0 : i32, i32
  }
  func.func @transform_4(%arg0: i32) -> (i32, i32) {
    %c0_i32 = arith.constant 0 : i32
    %c0_i32_0 = arith.constant 0 : i32
    %c0_i32_1 = arith.constant 0 : i32
    return %c0_i32, %c0_i32_0 : i32, i32
  }
  func.func @transform_5(%arg0: i32) -> (i32, i32) {
    %c0_i32 = arith.constant 0 : i32
    %c0_i32_0 = arith.constant 0 : i32
    return %arg0, %c0_i32 : i32, i32
  }
}

module attributes {stable_mosaic.version = 11 : i64} {
  func.func @block_masked_residual_kernel(%arg0: i32, %arg1: memref<16x128xf32, #tpu.memory_space<vmem>>, %arg2: memref<128x128xbf16, #tpu.memory_space<vmem>>, %arg3: memref<1x128xf32, #tpu.memory_space<vmem>>, %arg4: memref<128x128xbf16, #tpu.memory_space<vmem>>, %arg5: memref<1x128xf32, #tpu.memory_space<vmem>>, %arg6: memref<16x128xf32, #tpu.memory_space<vmem>>) attributes {dimension_semantics = [#tpu.dimension_semantics<parallel>], iteration_bounds = array<i64: 1>, scalar_prefetch = 0 : i64, scratch_operands = 0 : i64, tpu.core_type = #tpu.core_type<tc>, window_params = [{transform_indices = @transform_0, window_bounds = array<i64: 16, 128>}, {pipeline_mode = #tpu.pipeline_mode<synchronous>, transform_indices = @transform_1, window_bounds = array<i64: 128, 128>}, {pipeline_mode = #tpu.pipeline_mode<synchronous>, transform_indices = @transform_2, window_bounds = array<i64: 1, 128>}, {pipeline_mode = #tpu.pipeline_mode<synchronous>, transform_indices = @transform_3, window_bounds = array<i64: 128, 128>}, {pipeline_mode = #tpu.pipeline_mode<synchronous>, transform_indices = @transform_4, window_bounds = array<i64: 1, 128>}, {transform_indices = @transform_5, window_bounds = array<i64: 16, 128>}]} {
    %c0 = arith.constant 0 : index
    %c0_0 = arith.constant 0 : index
    %0 = vector.load %arg1[%c0, %c0_0] : memref<16x128xf32, #tpu.memory_space<vmem>>, vector<16x128xf32>
    %cst = arith.constant 0.000000e+00 : f32
    %1 = vector.broadcast %cst : f32 to vector<16x128xf32>
    %2 = arith.maximumf %0, %1 : vector<16x128xf32>
    %3 = arith.truncf %2 : vector<16x128xf32> to vector<16x128xbf16>
    %c0_1 = arith.constant 0 : index
    %c0_2 = arith.constant 0 : index
    %4 = vector.load %arg2[%c0_1, %c0_2] : memref<128x128xbf16, #tpu.memory_space<vmem>>, vector<128x128xbf16>
    %cst_3 = arith.constant dense<0.000000e+00> : vector<16x128xf32>
    %5 = tpu.matmul %3, %4, %cst_3 {dimension_numbers = #tpu.dot_dimension_numbers<[1], [0], [0], [1], [0, 0, 1, 1], [], []>} : vector<16x128xbf16>, vector<128x128xbf16>, vector<16x128xf32> -> vector<16x128xf32>
    %c0_4 = arith.constant 0 : index
    %c0_5 = arith.constant 0 : index
    %6 = vector.load %arg3[%c0_4, %c0_5] : memref<1x128xf32, #tpu.memory_space<vmem>>, vector<1x128xf32>
    %7 = vector.broadcast %6 : vector<1x128xf32> to vector<16x128xf32>
    %8 = arith.addf %5, %7 : vector<16x128xf32>
    %cst_6 = arith.constant 0.000000e+00 : f32
    %9 = vector.broadcast %cst_6 : f32 to vector<16x128xf32>
    %10 = arith.maximumf %8, %9 : vector<16x128xf32>
    %11 = arith.truncf %10 : vector<16x128xf32> to vector<16x128xbf16>
    %c0_7 = arith.constant 0 : index
    %c0_8 = arith.constant 0 : index
    %12 = vector.load %arg4[%c0_7, %c0_8] : memref<128x128xbf16, #tpu.memory_space<vmem>>, vector<128x128xbf16>
    %cst_9 = arith.constant dense<0.000000e+00> : vector<16x128xf32>
    %13 = tpu.matmul %11, %12, %cst_9 {dimension_numbers = #tpu.dot_dimension_numbers<[1], [0], [0], [1], [0, 0, 1, 1], [], []>} : vector<16x128xbf16>, vector<128x128xbf16>, vector<16x128xf32> -> vector<16x128xf32>
    %c0_10 = arith.constant 0 : index
    %c0_11 = arith.constant 0 : index
    %14 = vector.load %arg5[%c0_10, %c0_11] : memref<1x128xf32, #tpu.memory_space<vmem>>, vector<1x128xf32>
    %15 = vector.broadcast %14 : vector<1x128xf32> to vector<16x128xf32>
    %16 = arith.addf %13, %15 : vector<16x128xf32>
    %17 = arith.addf %0, %16 : vector<16x128xf32>
    %c0_12 = arith.constant 0 : index
    %c0_13 = arith.constant 0 : index
    %18 = vector.load %arg6[%c0_12, %c0_13] : memref<16x128xf32, #tpu.memory_space<vmem>>, vector<16x128xf32>
    tpu.vector_store %arg6[%c0_12, %c0_13], %17 {strides = array<i32>} : memref<16x128xf32, #tpu.memory_space<vmem>>, vector<16x128xf32>,
    return
  }
  func.func @transform_0(%arg0: i32) -> (i32, i32) {
    %c0_i32 = arith.constant 0 : i32
    %c0_i32_0 = arith.constant 0 : i32
    return %arg0, %c0_i32 : i32, i32
  }
  func.func @transform_1(%arg0: i32) -> (i32, i32) {
    %c0_i32 = arith.constant 0 : i32
    %c0_i32_0 = arith.constant 0 : i32
    %c0_i32_1 = arith.constant 0 : i32
    return %c0_i32, %c0_i32_0 : i32, i32
  }
  func.func @transform_2(%arg0: i32) -> (i32, i32) {
    %c0_i32 = arith.constant 0 : i32
    %c0_i32_0 = arith.constant 0 : i32
    %c0_i32_1 = arith.constant 0 : i32
    return %c0_i32, %c0_i32_0 : i32, i32
  }
  func.func @transform_3(%arg0: i32) -> (i32, i32) {
    %c0_i32 = arith.constant 0 : i32
    %c0_i32_0 = arith.constant 0 : i32
    %c0_i32_1 = arith.constant 0 : i32
    return %c0_i32, %c0_i32_0 : i32, i32
  }
  func.func @transform_4(%arg0: i32) -> (i32, i32) {
    %c0_i32 = arith.constant 0 : i32
    %c0_i32_0 = arith.constant 0 : i32
    %c0_i32_1 = arith.constant 0 : i32
    return %c0_i32, %c0_i32_0 : i32, i32
  }
  func.func @transform_5(%arg0: i32) -> (i32, i32) {
    %c0_i32 = arith.constant 0 : i32
    %c0_i32_0 = arith.constant 0 : i32
    return %arg0, %c0_i32 : i32, i32
  }
}

</mosaic_0001>

<bundles_post_ra>
// kernel: tpu_custom_call.1
= control target key start
LH: loop header
LB: loop body
LE: loop exit
PB: predicated region body
PF: predicated region fallthrough
CT: control target
= control target key end

     0   :  { %10 = vsyncpa [#allocation3], 0  ;;  %s569_s0 = inlined_call_operand.hbm [shape: f32[16,128], index: 0, kind: input, shape index: {}]   ;;  %s570_s1 = inlined_call_operand.hbm [shape: bf16[128,128], index: 1, kind: input, shape index: {}]   ;;  %s571_s2 = inlined_call_operand.vmem [shape: f32[1,128], index: 2, kind: input, shape index: {}]   ;;  %s572_s3 = inlined_call_operand.hbm [shape: bf16[128,128], index: 3, kind: input, shape index: {}]   ;;  %s573_s4 = inlined_call_operand.vmem [shape: f32[1,128], index: 4, kind: input, shape index: {}]   ;;  %s574_s5 = inlined_call_operand.hbm [shape: f32[16,128], index: 5, kind: output, shape index: {}]  }
   0x1   :  { %11 = vsyncpa [#allocation6], 0 }
   0x2   :  { %12 = vsyncpa [#allocation4], 0  ;;  %s505_s18 = smov [#allocation5]  }
   0x3   :  { %s30_s19 = sshll.u32 %s505_s18, 4  ;;  %s31_s19 = int_to_ptr.vmem [resolvable:$true] %s30_s19 }
   0x4   :  { %s427_s20 = scalar_lea.vmem %s31_s19, 1024  ;;  %p432_p1 = scmp.lt.s32.totalorder %s31_s19, %s31_s19 }
   0x5   :  { %p428_p0 = scmp.ne.s32.totalorder %s31_s19, %s427_s20  ;;  %p433_p2 = scmp.lt.s32.totalorder %s427_s20, %s427_s20 }
   0x7   :  { %p434_p3 = por %p433_p2, %p432_p1 }
   0x9   :  { %p435_p4 = pnand %p434_p3, %p428_p0 }
   0xb   :  { %438 = shalt.err (!%p435_p4)
}
   0xc   :  { %s506_s21 = smov 64   ;;  %s507_s22 = smov 4  }
   0xd   :  { %36 = dma.hbm_to_vmem [thread:$0]  %s570_s1, 1024, %s31_s19, [#allocation6], %s506_s21, %s506_s21, %s507_s22  }
   0xe   :  { %s508_s25 = smov [#allocation2]  }
   0xf   :  { %s18_s26 = sshll.u32 %s508_s25, 4  ;;  %s19_s26 = int_to_ptr.vmem [resolvable:$true] %s18_s26 }
  0x10   :  { %s447_s27 = scalar_lea.vmem %s19_s26, 256  ;;  %p452_p6 = scmp.lt.s32.totalorder %s19_s26, %s19_s26 }
  0x11   :  { %p448_p5 = scmp.ne.s32.totalorder %s19_s26, %s447_s27  ;;  %p453_p7 = scmp.lt.s32.totalorder %s447_s27, %s447_s27 }
  0x13   :  { %p454_p8 = por %p453_p7, %p452_p6 }
  0x15   :  { %p455_p9 = pnand %p454_p8, %p448_p5 }
  0x17   :  { %458 = shalt.err (!%p455_p9)
}
  0x18   :  { %s509_s28 = smov 128   ;;  %s510_s29 = smov 8  }
  0x19   :  { %24 = dma.hbm_to_vmem [thread:$0]  %s569_s0, 256, %s19_s26, [#allocation3], %s509_s28, %s509_s28, %s510_s29  }
  0x1a   :  { %s511_s1 = smov [#allocation7]  }
  0x1b   :  { %s44_s7 = sshll.u32 %s511_s1, 4  ;;  %s45_s7 = int_to_ptr.vmem [resolvable:$true] %s44_s7 }
  0x1c   :  { %s467_s8 = scalar_lea.vmem %s45_s7, 1024  ;;  %p472_p11 = scmp.lt.s32.totalorder %s45_s7, %s45_s7 }
  0x1d   :  { %p468_p10 = scmp.ne.s32.totalorder %s45_s7, %s467_s8  ;;  %p473_p12 = scmp.lt.s32.totalorder %s467_s8, %s467_s8 }
  0x1f   :  { %p474_p13 = por %p473_p12, %p472_p11 }
  0x21   :  { %p475_p0 = pnand %p474_p13, %p468_p10 }
  0x23   :  { %478 = shalt.err (!%p475_p0)
}
  0x24   :  { %50 = dma.hbm_to_vmem [thread:$0]  %s572_s3, 1024, %s45_s7, [#allocation6], %s506_s21, %s506_s21, %s507_s22  }
  0x25   :  { %499 = dma.done.wait [#allocation3], 256  }
  0x26   :  { %500 = vsyncadd [#allocation3], 4294967040 }
  0x27   :  { %501 = dma.done.wait [#allocation6], 2048  }
  0x28   :  { %502 = vsyncadd [#allocation6], 4294965248  ;;  %v512_v0 = vmov 0.0   ;;  %vm513_vm0 = vmmov 0   ;;  %v403_v1 = vld [vmem:[#allocation5 + $0x38] sm:$0xff]   ;;  %v404_v2 = vld [vmem:[#allocation5 + $0x30] sm:$0xff]  }
  0x29   :  { %353 = vmatprep.subr.bf16.mxu0 %v512_v0  ;;  %369 = vmatprep.mubr.msk.bf16.mxu0 %vm513_vm0, %v512_v0  ;;  %v405_v3 = vld [vmem:[#allocation5 + $0x28] sm:$0xff]   ;;  %v406_v4 = vld [vmem:[#allocation5 + $0x20] sm:$0xff]   ;;  %v411_v5 = vld [vmem:[#allocation7 + $0x38] sm:$0xff]  }
  0x2a   :  { %373 = vmatprep.subr.bf16.mxu1 %v512_v0  ;;  %389 = vmatprep.mubr.msk.bf16.mxu1 %vm513_vm0, %v512_v0  ;;  %v412_v6 = vld [vmem:[#allocation7 + $0x30] sm:$0xff]   ;;  %v407_v7 = vld [vmem:[#allocation5 + $0x18] sm:$0xff]   ;;  %v413_v8 = vld [vmem:[#allocation7 + $0x28] sm:$0xff]  }
  0x2b   :  { %354 = vmatpush3.bf16.msra.mxu0 %v403_v1  ;;  %374 = vmatpush3.bf16.msra.mxu1 %v411_v5  ;;  %v408_v9 = vld [vmem:[#allocation5 + $0x10] sm:$0xff]   ;;  %v414_v10 = vld [vmem:[#allocation7 + $0x20] sm:$0xff]   ;;  %v409_v11 = vld [vmem:[#allocation5 + $0x8] sm:$0xff]  }
  0x2c   :  { %355 = vmatprep.subr.bf16.mxu0 %v512_v0  ;;  %375 = vmatprep.subr.bf16.mxu1 %v512_v0  ;;  %v63_v12 = vld [vmem:[#allocation2] sm:$0xff]  ;;  %v64_v13 = vld [vmem:[#allocation2 + $0x8] sm:$0xff]  ;;  %v410_v17 = vld [vmem:[#allocation5] sm:$0xff]  }
  0x2d   :  { %v415_v14 = vld [vmem:[#allocation7 + $0x18] sm:$0xff]   ;;  %v65_v15 = vmax.f32 %v63_v12, 0.0  ;;  %v66_v16 = vmax.f32 %v64_v13, 0.0  ;;  %v416_v19 = vld [vmem:[#allocation7 + $0x10] sm:$0xff]   ;;  %v417_v20 = vld [vmem:[#allocation7 + $0x8] sm:$0xff]  }
  0x2e   :  { %v418_v21 = vld [vmem:[#allocation7] sm:$0xff]   ;;  %v317_v22 = vld [vmem:[%s571_s2] ss:$0 sm:$0xff]  ;;  %s514_s2 = smov [#allocation8]  }
  0x2f   :  { %356 = vmatpush3.bf16.msra.mxu0 %v404_v2  ;;  %376 = vmatpush3.bf16.msra.mxu1 %v412_v6  ;;  %v67_v18 = vpack.c.bf16 %v66_v16, %v65_v15  ;;  %v326_v32 = vld [vmem:[%s573_s4] ss:$0 sm:$0xff]  ;;  %s304_s13 = sshll.u32 %s514_s2, 4  ;;  %s305_s13 = int_to_ptr.vmem [resolvable:$true] %s304_s13 }
  0x30   :  { %357 = vmatprep.subr.bf16.mxu0 %v512_v0  ;;  %377 = vmatprep.subr.bf16.mxu1 %v512_v0  ;;  %s479_s14 = scalar_lea.vmem %s305_s13, 256  ;;  %p484_p2 = scmp.lt.s32.totalorder %s305_s13, %s305_s13 }
  0x31   :  { %p480_p1 = scmp.ne.s32.totalorder %s305_s13, %s479_s14  ;;  %p485_p3 = scmp.lt.s32.totalorder %s479_s14, %s479_s14 }
  0x33   :  { %358 = vmatpush3.bf16.msra.mxu0 %v405_v3  ;;  %378 = vmatpush3.bf16.msra.mxu1 %v413_v8  ;;  %p486_p4 = por %p485_p3, %p484_p2 }
  0x34   :  { %359 = vmatprep.subr.bf16.mxu0 %v512_v0  ;;  %379 = vmatprep.subr.bf16.mxu1 %v512_v0 }
  0x35   :  { %p487_p5 = pnand %p486_p4, %p480_p1 }
  0x37   :  { %360 = vmatpush3.bf16.msra.mxu0 %v406_v4  ;;  %380 = vmatpush3.bf16.msra.mxu1 %v414_v10 }
  0x38   :  { %361 = vmatprep.subr.bf16.mxu0 %v512_v0  ;;  %381 = vmatprep.subr.bf16.mxu1 %v512_v0 }
  0x3b   :  { %362 = vmatpush3.bf16.msra.mxu0 %v407_v7  ;;  %382 = vmatpush3.bf16.msra.mxu1 %v415_v14 }
  0x3c   :  { %363 = vmatprep.subr.bf16.mxu0 %v512_v0  ;;  %383 = vmatprep.subr.bf16.mxu1 %v512_v0 }
  0x3f   :  { %364 = vmatpush3.bf16.msra.mxu0 %v408_v9  ;;  %384 = vmatpush3.bf16.msra.mxu1 %v416_v19 }
  0x40   :  { %365 = vmatprep.subr.bf16.mxu0 %v512_v0  ;;  %385 = vmatprep.subr.bf16.mxu1 %v512_v0 }
  0x43   :  { %366 = vmatpush3.bf16.msra.mxu0 %v409_v11  ;;  %386 = vmatpush3.bf16.msra.mxu1 %v417_v20 }
  0x44   :  { %367 = vmatprep.subr.bf16.mxu0 %v512_v0  ;;  %387 = vmatprep.subr.bf16.mxu1 %v512_v0 }
  0x47   :  { %368 = vmatpush3.bf16.msra.mxu0 %v410_v17  ;;  %388 = vmatpush3.bf16.msra.mxu1 %v418_v21 }
  0x4a   :  { %370 = vmatmul.mubr.bf16.vlgmr.msra.gmra.mxu0 %v67_v18 }
 0x10a   :  { %v173_v23 = vpop.f32.mrf.mxu0 }
 0x10b   :  { %v174_v25 = vadd.f32 %v317_v22, %v173_v23 }
 0x10c   :  { %v371_v24 = vpop.f32.mrf.mxu0 }
 0x10d   :  { %v180_v29 = vmax.f32 %v174_v25, 0.0 }
 0x10e   :  { %v176_v26 = vpop.f32.mrf.mxu0 }
 0x10f   :  { %v177_v27 = vadd.f32 %v317_v22, %v176_v26 }
 0x110   :  { %v372_v28 = vpop.f32.mrf.mxu0 }
 0x111   :  { %v181_v30 = vmax.f32 %v177_v27, 0.0 }
 0x113   :  { %v182_v31 = vpack.c.bf16 %v181_v30, %v180_v29 }
 0x115   :  { %390 = vmatmul.mubr.bf16.vlgmr.msra.gmra.mxu1 %v182_v31 }
 0x1d5   :  { %v288_v33 = vpop.f32.mrf.mxu1 }
 0x1d6   :  { %v289_v34 = vadd.f32 %v326_v32, %v288_v33 }
 0x1d7   :  { %v391_v35 = vpop.f32.mrf.mxu1 }
 0x1d8   :  { %v295_v36 = vadd.f32 %v289_v34, %v63_v12 }
 0x1d9   :  { %v291_v37 = vpop.f32.mrf.mxu1 }
 0x1da   :  { %297 = vst [vmem:[#allocation8] sm:$0xff] %v295_v36  ;;  %v292_v38 = vadd.f32 %v326_v32, %v291_v37 }
 0x1db   :  { %v392_v39 = vpop.f32.mrf.mxu1 }
 0x1dc   :  { %v296_v40 = vadd.f32 %v292_v38, %v64_v13 }
 0x1de   :  { %298 = vst [vmem:[#allocation8 + $0x8] sm:$0xff] %v296_v40 }
 0x1df   :  { %490 = shalt.err (!%p487_p5)
}
 0x1e0   :  { %310 = dma.vmem_to_hbm [thread:$0]  %s305_s13, 256, %s574_s5, [#allocation4], %s509_s28, %s509_s28, %s510_s29  }
 0x1e1   :  { %503 = dma.done.wait [#allocation4], 256  }
 0x1e2   :  { %504 = vsyncadd [#allocation4], 4294967040 }
 0x1e3   :  { %314 = vsyncpa [#allocation3], 1 }
 0x1e4   :  { %315 = vsyncpa [#allocation6], 1 }
 0x1e5   :  { %316 = vsyncpa [#allocation4], 1 }

// kernel: tpu_custom_call.1
= control target key start
LH: loop header
LB: loop body
LE: loop exit
PB: predicated region body
PF: predicated region fallthrough
CT: control target
= control target key end

     0   :  { %10 = vsyncpa [#allocation3], 0  ;;  %s569_s0 = inlined_call_operand.hbm [shape: f32[16,128], index: 0, kind: input, shape index: {}]   ;;  %s570_s1 = inlined_call_operand.hbm [shape: bf16[128,128], index: 1, kind: input, shape index: {}]   ;;  %s571_s2 = inlined_call_operand.vmem [shape: f32[1,128], index: 2, kind: input, shape index: {}]   ;;  %s572_s3 = inlined_call_operand.hbm [shape: bf16[128,128], index: 3, kind: input, shape index: {}]   ;;  %s573_s4 = inlined_call_operand.vmem [shape: f32[1,128], index: 4, kind: input, shape index: {}]   ;;  %s574_s5 = inlined_call_operand.hbm [shape: f32[16,128], index: 5, kind: output, shape index: {}]  }
   0x1   :  { %11 = vsyncpa [#allocation6], 0 }
   0x2   :  { %12 = vsyncpa [#allocation4], 0  ;;  %s505_s18 = smov [#allocation5]  }
   0x3   :  { %s30_s19 = sshll.u32 %s505_s18, 4  ;;  %s31_s19 = int_to_ptr.vmem [resolvable:$true] %s30_s19 }
   0x4   :  { %s427_s20 = scalar_lea.vmem %s31_s19, 1024  ;;  %p432_p1 = scmp.lt.s32.totalorder %s31_s19, %s31_s19 }
   0x5   :  { %p428_p0 = scmp.ne.s32.totalorder %s31_s19, %s427_s20  ;;  %p433_p2 = scmp.lt.s32.totalorder %s427_s20, %s427_s20 }
   0x7   :  { %p434_p3 = por %p433_p2, %p432_p1 }
   0x9   :  { %p435_p4 = pnand %p434_p3, %p428_p0 }
   0xb   :  { %438 = shalt.err (!%p435_p4)
}
   0xc   :  { %s506_s21 = smov 64   ;;  %s507_s22 = smov 4  }
   0xd   :  { %36 = dma.hbm_to_vmem [thread:$0]  %s570_s1, 1024, %s31_s19, [#allocation6], %s506_s21, %s506_s21, %s507_s22  }
   0xe   :  { %s508_s25 = smov [#allocation2]  }
   0xf   :  { %s18_s26 = sshll.u32 %s508_s25, 4  ;;  %s19_s26 = int_to_ptr.vmem [resolvable:$true] %s18_s26 }
  0x10   :  { %s447_s27 = scalar_lea.vmem %s19_s26, 256  ;;  %p452_p6 = scmp.lt.s32.totalorder %s19_s26, %s19_s26 }
  0x11   :  { %p448_p5 = scmp.ne.s32.totalorder %s19_s26, %s447_s27  ;;  %p453_p7 = scmp.lt.s32.totalorder %s447_s27, %s447_s27 }
  0x13   :  { %p454_p8 = por %p453_p7, %p452_p6 }
  0x15   :  { %p455_p9 = pnand %p454_p8, %p448_p5 }
  0x17   :  { %458 = shalt.err (!%p455_p9)
}
  0x18   :  { %s509_s28 = smov 128   ;;  %s510_s29 = smov 8  }
  0x19   :  { %24 = dma.hbm_to_vmem [thread:$0]  %s569_s0, 256, %s19_s26, [#allocation3], %s509_s28, %s509_s28, %s510_s29  }
  0x1a   :  { %s511_s1 = smov [#allocation7]  }
  0x1b   :  { %s44_s7 = sshll.u32 %s511_s1, 4  ;;  %s45_s7 = int_to_ptr.vmem [resolvable:$true] %s44_s7 }
  0x1c   :  { %s467_s8 = scalar_lea.vmem %s45_s7, 1024  ;;  %p472_p11 = scmp.lt.s32.totalorder %s45_s7, %s45_s7 }
  0x1d   :  { %p468_p10 = scmp.ne.s32.totalorder %s45_s7, %s467_s8  ;;  %p473_p12 = scmp.lt.s32.totalorder %s467_s8, %s467_s8 }
  0x1f   :  { %p474_p13 = por %p473_p12, %p472_p11 }
  0x21   :  { %p475_p0 = pnand %p474_p13, %p468_p10 }
  0x23   :  { %478 = shalt.err (!%p475_p0)
}
  0x24   :  { %50 = dma.hbm_to_vmem [thread:$0]  %s572_s3, 1024, %s45_s7, [#allocation6], %s506_s21, %s506_s21, %s507_s22  }
  0x25   :  { %499 = dma.done.wait [#allocation3], 256  }
  0x26   :  { %500 = vsyncadd [#allocation3], 4294967040 }
  0x27   :  { %501 = dma.done.wait [#allocation6], 2048  }
  0x28   :  { %502 = vsyncadd [#allocation6], 4294965248  ;;  %v512_v0 = vmov 0.0   ;;  %vm513_vm0 = vmmov 0   ;;  %v403_v1 = vld [vmem:[#allocation5 + $0x38] sm:$0xff]   ;;  %v404_v2 = vld [vmem:[#allocation5 + $0x30] sm:$0xff]  }
  0x29   :  { %353 = vmatprep.subr.bf16.mxu0 %v512_v0  ;;  %369 = vmatprep.mubr.msk.bf16.mxu0 %vm513_vm0, %v512_v0  ;;  %v405_v3 = vld [vmem:[#allocation5 + $0x28] sm:$0xff]   ;;  %v406_v4 = vld [vmem:[#allocation5 + $0x20] sm:$0xff]   ;;  %v411_v5 = vld [vmem:[#allocation7 + $0x38] sm:$0xff]  }
  0x2a   :  { %373 = vmatprep.subr.bf16.mxu1 %v512_v0  ;;  %389 = vmatprep.mubr.msk.bf16.mxu1 %vm513_vm0, %v512_v0  ;;  %v412_v6 = vld [vmem:[#allocation7 + $0x30] sm:$0xff]   ;;  %v407_v7 = vld [vmem:[#allocation5 + $0x18] sm:$0xff]   ;;  %v413_v8 = vld [vmem:[#allocation7 + $0x28] sm:$0xff]  }
  0x2b   :  { %354 = vmatpush3.bf16.msra.mxu0 %v403_v1  ;;  %374 = vmatpush3.bf16.msra.mxu1 %v411_v5  ;;  %v408_v9 = vld [vmem:[#allocation5 + $0x10] sm:$0xff]   ;;  %v414_v10 = vld [vmem:[#allocation7 + $0x20] sm:$0xff]   ;;  %v409_v11 = vld [vmem:[#allocation5 + $0x8] sm:$0xff]  }
  0x2c   :  { %355 = vmatprep.subr.bf16.mxu0 %v512_v0  ;;  %375 = vmatprep.subr.bf16.mxu1 %v512_v0  ;;  %v63_v12 = vld [vmem:[#allocation2] sm:$0xff]  ;;  %v64_v13 = vld [vmem:[#allocation2 + $0x8] sm:$0xff]  ;;  %v410_v17 = vld [vmem:[#allocation5] sm:$0xff]  }
  0x2d   :  { %v415_v14 = vld [vmem:[#allocation7 + $0x18] sm:$0xff]   ;;  %v65_v15 = vmax.f32 %v63_v12, 0.0  ;;  %v66_v16 = vmax.f32 %v64_v13, 0.0  ;;  %v416_v19 = vld [vmem:[#allocation7 + $0x10] sm:$0xff]   ;;  %v417_v20 = vld [vmem:[#allocation7 + $0x8] sm:$0xff]  }
  0x2e   :  { %v418_v21 = vld [vmem:[#allocation7] sm:$0xff]   ;;  %v317_v22 = vld [vmem:[%s571_s2] ss:$0 sm:$0xff]  ;;  %s514_s2 = smov [#allocation8]  }
  0x2f   :  { %356 = vmatpush3.bf16.msra.mxu0 %v404_v2  ;;  %376 = vmatpush3.bf16.msra.mxu1 %v412_v6  ;;  %v67_v18 = vpack.c.bf16 %v66_v16, %v65_v15  ;;  %v326_v32 = vld [vmem:[%s573_s4] ss:$0 sm:$0xff]  ;;  %s304_s13 = sshll.u32 %s514_s2, 4  ;;  %s305_s13 = int_to_ptr.vmem [resolvable:$true] %s304_s13 }
  0x30   :  { %357 = vmatprep.subr.bf16.mxu0 %v512_v0  ;;  %377 = vmatprep.subr.bf16.mxu1 %v512_v0  ;;  %s479_s14 = scalar_lea.vmem %s305_s13, 256  ;;  %p484_p2 = scmp.lt.s32.totalorder %s305_s13, %s305_s13 }
  0x31   :  { %p480_p1 = scmp.ne.s32.totalorder %s305_s13, %s479_s14  ;;  %p485_p3 = scmp.lt.s32.totalorder %s479_s14, %s479_s14 }
  0x33   :  { %358 = vmatpush3.bf16.msra.mxu0 %v405_v3  ;;  %378 = vmatpush3.bf16.msra.mxu1 %v413_v8  ;;  %p486_p4 = por %p485_p3, %p484_p2 }
  0x34   :  { %359 = vmatprep.subr.bf16.mxu0 %v512_v0  ;;  %379 = vmatprep.subr.bf16.mxu1 %v512_v0 }
  0x35   :  { %p487_p5 = pnand %p486_p4, %p480_p1 }
  0x37   :  { %360 = vmatpush3.bf16.msra.mxu0 %v406_v4  ;;  %380 = vmatpush3.bf16.msra.mxu1 %v414_v10 }
  0x38   :  { %361 = vmatprep.subr.bf16.mxu0 %v512_v0  ;;  %381 = vmatprep.subr.bf16.mxu1 %v512_v0 }
  0x3b   :  { %362 = vmatpush3.bf16.msra.mxu0 %v407_v7  ;;  %382 = vmatpush3.bf16.msra.mxu1 %v415_v14 }
  0x3c   :  { %363 = vmatprep.subr.bf16.mxu0 %v512_v0  ;;  %383 = vmatprep.subr.bf16.mxu1 %v512_v0 }
  0x3f   :  { %364 = vmatpush3.bf16.msra.mxu0 %v408_v9  ;;  %384 = vmatpush3.bf16.msra.mxu1 %v416_v19 }
  0x40   :  { %365 = vmatprep.subr.bf16.mxu0 %v512_v0  ;;  %385 = vmatprep.subr.bf16.mxu1 %v512_v0 }
  0x43   :  { %366 = vmatpush3.bf16.msra.mxu0 %v409_v11  ;;  %386 = vmatpush3.bf16.msra.mxu1 %v417_v20 }
  0x44   :  { %367 = vmatprep.subr.bf16.mxu0 %v512_v0  ;;  %387 = vmatprep.subr.bf16.mxu1 %v512_v0 }
  0x47   :  { %368 = vmatpush3.bf16.msra.mxu0 %v410_v17  ;;  %388 = vmatpush3.bf16.msra.mxu1 %v418_v21 }
  0x4a   :  { %370 = vmatmul.mubr.bf16.vlgmr.msra.gmra.mxu0 %v67_v18 }
 0x10a   :  { %v173_v23 = vpop.f32.mrf.mxu0 }
 0x10b   :  { %v174_v25 = vadd.f32 %v317_v22, %v173_v23 }
 0x10c   :  { %v371_v24 = vpop.f32.mrf.mxu0 }
 0x10d   :  { %v180_v29 = vmax.f32 %v174_v25, 0.0 }
 0x10e   :  { %v176_v26 = vpop.f32.mrf.mxu0 }
 0x10f   :  { %v177_v27 = vadd.f32 %v317_v22, %v176_v26 }
 0x110   :  { %v372_v28 = vpop.f32.mrf.mxu0 }
 0x111   :  { %v181_v30 = vmax.f32 %v177_v27, 0.0 }
 0x113   :  { %v182_v31 = vpack.c.bf16 %v181_v30, %v180_v29 }
 0x115   :  { %390 = vmatmul.mubr.bf16.vlgmr.msra.gmra.mxu1 %v182_v31 }
 0x1d5   :  { %v288_v33 = vpop.f32.mrf.mxu1 }
 0x1d6   :  { %v289_v34 = vadd.f32 %v326_v32, %v288_v33 }
 0x1d7   :  { %v391_v35 = vpop.f32.mrf.mxu1 }
 0x1d8   :  { %v295_v36 = vadd.f32 %v289_v34, %v63_v12 }
 0x1d9   :  { %v291_v37 = vpop.f32.mrf.mxu1 }
 0x1da   :  { %297 = vst [vmem:[#allocation8] sm:$0xff] %v295_v36  ;;  %v292_v38 = vadd.f32 %v326_v32, %v291_v37 }
 0x1db   :  { %v392_v39 = vpop.f32.mrf.mxu1 }
 0x1dc   :  { %v296_v40 = vadd.f32 %v292_v38, %v64_v13 }
 0x1de   :  { %298 = vst [vmem:[#allocation8 + $0x8] sm:$0xff] %v296_v40 }
 0x1df   :  { %490 = shalt.err (!%p487_p5)
}
 0x1e0   :  { %310 = dma.vmem_to_hbm [thread:$0]  %s305_s13, 256, %s574_s5, [#allocation4], %s509_s28, %s509_s28, %s510_s29  }
 0x1e1   :  { %503 = dma.done.wait [#allocation4], 256  }
 0x1e2   :  { %504 = vsyncadd [#allocation4], 4294967040 }
 0x1e3   :  { %314 = vsyncpa [#allocation3], 1 }
 0x1e4   :  { %315 = vsyncpa [#allocation6], 1 }
 0x1e5   :  { %316 = vsyncpa [#allocation4], 1 }

</bundles_post_ra>
